<compile_context>
chip_gen: v7x
topology: tpu7x:2x2x1
jax: 0.10.0
libtpu: 0.0.40
codegen_flags: <defaults>
</compile_context>

<pallas_src>
import functools

import jax
import jax.numpy as jnp
from jax.experimental import pallas as pl
from jax.experimental.pallas import tpu as pltpu


def _round_up(x, m):
    return ((x + m - 1) // m) * m


def _cdiv(a, b):
    return (a + b - 1) // b


def _tpu_generation():
    """Best-effort TPU generation (4/5/6/7). Falls back to 6 (safe, conservative caps)."""
    try:
        kind = jax.devices()[0].device_kind.lower()
    except Exception:
        return 6
    for gen in (7, 6, 5, 4):
        if f"v{gen}" in kind:
            return gen
    return 6


def _link_predictor_kernel(xi_ref, xj_ref,
                           w0_ref, b0_ref,
                           w1_ref, b1_ref,
                           w2_ref, b2_ref,
                           o_ref, *, mul_in_compute_dtype):
    # Elementwise product of the two endpoint embeddings.
    if mul_in_compute_dtype:
        # v6e/v7x have bf16 VALUs: multiply directly in the streamed dtype (no cast round-trip).
        x = xi_ref[...] * xj_ref[...]
    else:
        # v5e (no bf16 VALU) or f32 path: multiply in f32, feed the MXU in the weight dtype.
        x = (xi_ref[...].astype(jnp.float32) *
             xj_ref[...].astype(jnp.float32)).astype(w0_ref.dtype)

    # Hidden layer 0: Linear + ReLU (block-diagonal packed). f32 MXU accumulation.
    h = jnp.dot(x, w0_ref[...], preferred_element_type=jnp.float32) + b0_ref[...]
    h = jnp.maximum(h, 0.0)

    # Hidden layer 1: Linear + ReLU.
    h = jnp.dot(h.astype(w1_ref.dtype), w1_ref[...],
                preferred_element_type=jnp.float32) + b1_ref[...]
    h = jnp.maximum(h, 0.0)

    # Output layer (hidden -> 1) as a packed block-diagonal column selector:
    # (tile_bp, 128) @ (128, P) -> one logit column per packed row group.
    z = jnp.dot(h, w2_ref[...], preferred_element_type=jnp.float32) + b2_ref[...]
    o_ref[...] = jax.nn.sigmoid(z).astype(o_ref.dtype)


def link_predictor_forward(x_i, x_j, params, *, tile_b=None,
                           compute_dtype=jnp.bfloat16):
    """Fused forward for LinkPredictor(num_layers=3) in eval mode.

    params: dict with
      w0: [in_ch, hidden]    b0: [1, hidden]
      w1: [hidden, hidden]   b1: [1, hidden]
      w2: [hidden, out_ch]   b2: [1, out_ch]
    compute_dtype: dtype for the streamed activations and hidden-layer weights
      (jnp.bfloat16 default, or jnp.float32); accumulation / biases / sigmoid stay f32.
    tile_b: logical rows per grid step (None = generation-aware default).
    """
    B, in_ch = x_i.shape
    hidden = params["w0"].shape[1]
    out_ch = params["w2"].shape[1]
    out_dtype = x_i.dtype
    gen = _tpu_generation()
    is_bf16 = jnp.dtype(compute_dtype) == jnp.dtype(jnp.bfloat16)

    # ---- lane packing: P logical rows per 128-lane vreg ----------------------
    if in_ch == hidden and in_ch <= 128 and 128 % in_ch == 0:
        P = 128 // in_ch            # 4 for the 32-wide citation2 config
    else:
        P = 1                       # degenerate: packed path == plain path
    pin, phid, pout = P * in_ch, P * hidden, P * out_ch

    # Pad the batch only up to a multiple of P (<= P-1 zero rows, negligible HBM traffic)
    # so the row-major (B, in_ch) -> (B/P, P*in_ch) reshape is exact. No tile-level
    # padding: Pallas handles the partial last grid block (OOB output rows are dropped).
    pad_rows = (-B) % P
    if pad_rows:
        x_i = jnp.pad(x_i, ((0, pad_rows), (0, 0)))
        x_j = jnp.pad(x_j, ((0, pad_rows), (0, 0)))
    Bp = (B + pad_rows) // P

    xi = x_i.astype(compute_dtype).reshape(Bp, pin)
    xj = x_j.astype(compute_dtype).reshape(Bp, pin)

    # Block-diagonal packed weights (kron(I_P, W)) and lane-tiled biases.
    eye = jnp.eye(P, dtype=jnp.float32)
    w0 = jnp.kron(eye, params["w0"].astype(jnp.float32)).astype(compute_dtype)
    w1 = jnp.kron(eye, params["w1"].astype(jnp.float32)).astype(compute_dtype)
    w2 = jnp.kron(eye, params["w2"].astype(jnp.float32))              # (phid, pout) f32 selector
    b0 = jnp.tile(params["b0"].reshape(1, hidden).astype(jnp.float32), (1, P))
    b1 = jnp.tile(params["b1"].reshape(1, hidden).astype(jnp.float32), (1, P))
    b2 = jnp.tile(params["b2"].reshape(1, out_ch).astype(jnp.float32), (1, P))

    # ---- tile sizing (in packed rows) ----------------------------------------
    if tile_b is None:
        # v5e/v6e: 128 MiB VMEM -> bigger tiles amortize the ~0.35us per-step overhead.
        # v7x: 64 MiB VMEM but 3.2 TB/s HBM -> somewhat smaller default.
        tile_b = 8192 if gen >= 7 else 16384
    tile_bp = _round_up(_cdiv(max(tile_b, P), P), 128)
    tile_bp = max(8, min(tile_bp, _round_up(Bp, 8)))

    # v7x megacore: at least two (and an even number of) batch tiles so both TCs get work.
    if gen >= 7 and Bp >= 16:
        n = _cdiv(Bp, tile_bp)
        if n % 2 == 1:
            n_even = 2 if n == 1 else n + 1
            tile_bp = max(8, _round_up(_cdiv(Bp, n_even), 8))

    num_tiles = _cdiv(Bp, tile_bp)

    # ---- VMEM budget: packed tiles are lane-dense (tile_bp, 128) -------------
    act_item = jnp.dtype(compute_dtype).itemsize
    out_item = jnp.dtype(out_dtype).itemsize
    act_buf = tile_bp * 128 * act_item
    out_buf = tile_bp * 128 * out_item          # (tile_bp, pout) lane-pads in VMEM
    f32_row = tile_bp * 128 * 4
    est = 2 * 2 * act_buf + 2 * out_buf + 4 * f32_row + (2 << 20)
    cap = (52 << 20) if gen >= 7 else (96 << 20)   # headroom under 64 / 128 MiB physical
    vmem_limit = int(min(max(est, 32 << 20), cap))

    # ---- cost estimate (helps XLA schedule around the custom call) -----------
    flops = 2 * Bp * (pin * phid + phid * phid + phid * pout)
    bytes_accessed = (2 * Bp * pin * act_item
                      + (pin * phid + phid * phid) * act_item
                      + (phid * pout + 2 * phid + pout) * 4
                      + Bp * pout * out_item)
    cost = pl.CostEstimate(flops=int(flops),
                           transcendentals=int(Bp * pout),
                           bytes_accessed=int(bytes_accessed))

    act_spec = pl.BlockSpec((tile_bp, pin), lambda i: (i, 0))
    resident = lambda shape: pl.BlockSpec(shape, lambda i: (0, 0))

    kernel = functools.partial(
        _link_predictor_kernel,
        mul_in_compute_dtype=bool(is_bf16 and gen >= 6))

    out_packed = pl.pallas_call(
        kernel,
        out_shape=jax.ShapeDtypeStruct((Bp, pout), out_dtype),
        grid_spec=pltpu.PrefetchScalarGridSpec(
            num_scalar_prefetch=0,
            grid=(num_tiles,),
            in_specs=[
                act_spec,                 # x_i packed tile (streamed)
                act_spec,                 # x_j packed tile (streamed)
                resident((pin, phid)),    # w0 block-diagonal (VMEM-resident)
                resident((1, phid)),      # b0 tiled
                resident((phid, phid)),   # w1 block-diagonal
                resident((1, phid)),      # b1 tiled
                resident((phid, pout)),   # w2 block-diagonal column selector
                resident((1, pout)),      # b2 tiled
            ],
            out_specs=pl.BlockSpec((tile_bp, pout), lambda i: (i, 0)),
        ),
        compiler_params=pltpu.CompilerParams(
            dimension_semantics=("parallel",),   # shard batch tiles across TCs on v7x
            vmem_limit_bytes=vmem_limit,
        ),
        cost_estimate=cost,
    )(xi, xj, w0, b0, w1, b1, w2, b2)

    # Free row-major unpack back to one row per logical edge; drop the pack pad.
    return out_packed.reshape(Bp * P, out_ch)[:B]


def init_link_predictor_params(key, in_channels, hidden_channels, out_channels):
    """Deterministic init mirroring torch.nn.Linear default (Kaiming-uniform-ish)."""
    def linear_init(k, fan_in, fan_out):
        k_w, k_b = jax.random.split(k)
        bound = 1.0 / jnp.sqrt(jnp.float32(fan_in))
        # stored pre-transposed: [fan_in, fan_out]
        w = jax.random.uniform(k_w, (fan_in, fan_out), jnp.float32, -bound, bound)
        b = jax.random.uniform(k_b, (1, fan_out), jnp.float32, -bound, bound)
        return w, b

    k0, k1, k2 = jax.random.split(key, 3)
    w0, b0 = linear_init(k0, in_channels, hidden_channels)
    w1, b1 = linear_init(k1, hidden_channels, hidden_channels)
    w2, b2 = linear_init(k2, hidden_channels, out_channels)
    return dict(w0=w0, b0=b0, w1=w1, b1=b1, w2=w2, b2=b2)


def link_predictor_ref(x_i, x_j, params):
    """Pure-JAX reference for correctness check (eval mode: dropout = identity)."""
    x = x_i * x_j
    x = jax.nn.relu(x @ params["w0"] + params["b0"])
    x = jax.nn.relu(x @ params["w1"] + params["b1"])
    return jax.nn.sigmoid(x @ params["w2"] + params["b2"])


if __name__ == "__main__":
    # Module config: LinkPredictor(in_channels=32, hidden_channels=32,
    #                              out_channels=1, num_layers=3, dropout=0.5), eval mode.
    in_channels, hidden_channels, out_channels = 32, 32, 1
    batch = 300  # not a multiple of 4 or of the batch tile -> exercises pack-pad + partial block

    key = jax.random.PRNGKey(0)
    k_params, k_xi, k_xj = jax.random.split(key, 3)

    params = init_link_predictor_params(k_params, in_channels, hidden_channels,
                                        out_channels)
    x_i = jax.random.normal(k_xi, (batch, in_channels), jnp.float32)
    x_j = jax.random.normal(k_xj, (batch, in_channels), jnp.float32)

    ref = link_predictor_ref(x_i, x_j, params)

    # f32 path (tight tolerance).
    out_f32 = jax.block_until_ready(
        link_predictor_forward(x_i, x_j, params, compute_dtype=jnp.float32))
    assert out_f32.shape == (batch, out_channels)
    assert jnp.allclose(out_f32, ref, atol=1e-5, rtol=1e-5), "f32 mismatch vs reference"

    # Default path: bf16 streamed activations/hidden weights, f32 accumulation.
    out_bf16 = jax.block_until_ready(link_predictor_forward(x_i, x_j, params))
    assert out_bf16.shape == (batch, out_channels)
    assert jnp.allclose(out_bf16, ref, atol=5e-2), "bf16 mismatch vs reference"

    print("KERNEL_OK")
</pallas_src>

<mosaic_0001>
module attributes {stable_mosaic.version = 11 : i64} {
  func.func @_link_predictor_kernel(%arg0: i32, %arg1: memref<80x128xf32, #tpu.memory_space<vmem>>, %arg2: memref<80x128xf32, #tpu.memory_space<vmem>>, %arg3: memref<128x128xf32, #tpu.memory_space<vmem>>, %arg4: memref<1x128xf32, #tpu.memory_space<vmem>>, %arg5: memref<128x128xf32, #tpu.memory_space<vmem>>, %arg6: memref<1x128xf32, #tpu.memory_space<vmem>>, %arg7: memref<128x4xf32, #tpu.memory_space<vmem>>, %arg8: memref<1x4xf32, #tpu.memory_space<vmem>>, %arg9: memref<80x4xf32, #tpu.memory_space<vmem>>) attributes {dimension_semantics = [#tpu.dimension_semantics<parallel>], iteration_bounds = array<i64: 1>, scalar_prefetch = 0 : i64, scratch_operands = 0 : i64, tpu.core_type = #tpu.core_type<tc>, window_params = [{transform_indices = @transform_0, window_bounds = array<i64: 80, 128>}, {transform_indices = @transform_1, window_bounds = array<i64: 80, 128>}, {pipeline_mode = #tpu.pipeline_mode<synchronous>, transform_indices = @transform_2, window_bounds = array<i64: 128, 128>}, {pipeline_mode = #tpu.pipeline_mode<synchronous>, transform_indices = @transform_3, window_bounds = array<i64: 1, 128>}, {pipeline_mode = #tpu.pipeline_mode<synchronous>, transform_indices = @transform_4, window_bounds = array<i64: 128, 128>}, {pipeline_mode = #tpu.pipeline_mode<synchronous>, transform_indices = @transform_5, window_bounds = array<i64: 1, 128>}, {pipeline_mode = #tpu.pipeline_mode<synchronous>, transform_indices = @transform_6, window_bounds = array<i64: 128, 4>}, {pipeline_mode = #tpu.pipeline_mode<synchronous>, transform_indices = @transform_7, window_bounds = array<i64: 1, 4>}, {transform_indices = @transform_8, window_bounds = array<i64: 80, 4>}]} {
    %c0 = arith.constant 0 : index
    %c0_0 = arith.constant 0 : index
    %0 = vector.load %arg1[%c0, %c0_0] : memref<80x128xf32, #tpu.memory_space<vmem>>, vector<80x128xf32>
    %c0_1 = arith.constant 0 : index
    %c0_2 = arith.constant 0 : index
    %1 = vector.load %arg2[%c0_1, %c0_2] : memref<80x128xf32, #tpu.memory_space<vmem>>, vector<80x128xf32>
    %2 = arith.mulf %0, %1 : vector<80x128xf32>
    %c0_3 = arith.constant 0 : index
    %c0_4 = arith.constant 0 : index
    %3 = vector.load %arg3[%c0_3, %c0_4] : memref<128x128xf32, #tpu.memory_space<vmem>>, vector<128x128xf32>
    %cst = arith.constant dense<0.000000e+00> : vector<80x128xf32>
    %4 = tpu.matmul %2, %3, %cst {dimension_numbers = #tpu.dot_dimension_numbers<[1], [0], [0], [1], [0, 0, 1, 1], [], []>} : vector<80x128xf32>, vector<128x128xf32>, vector<80x128xf32> -> vector<80x128xf32>
    %c0_5 = arith.constant 0 : index
    %c0_6 = arith.constant 0 : index
    %5 = vector.load %arg4[%c0_5, %c0_6] : memref<1x128xf32, #tpu.memory_space<vmem>>, vector<1x128xf32>
    %6 = vector.broadcast %5 : vector<1x128xf32> to vector<80x128xf32>
    %7 = arith.addf %4, %6 : vector<80x128xf32>
    %cst_7 = arith.constant 0.000000e+00 : f32
    %8 = vector.broadcast %cst_7 : f32 to vector<80x128xf32>
    %9 = arith.maximumf %7, %8 : vector<80x128xf32>
    %c0_8 = arith.constant 0 : index
    %c0_9 = arith.constant 0 : index
    %10 = vector.load %arg5[%c0_8, %c0_9] : memref<128x128xf32, #tpu.memory_space<vmem>>, vector<128x128xf32>
    %cst_10 = arith.constant dense<0.000000e+00> : vector<80x128xf32>
    %11 = tpu.matmul %9, %10, %cst_10 {dimension_numbers = #tpu.dot_dimension_numbers<[1], [0], [0], [1], [0, 0, 1, 1], [], []>} : vector<80x128xf32>, vector<128x128xf32>, vector<80x128xf32> -> vector<80x128xf32>
    %c0_11 = arith.constant 0 : index
    %c0_12 = arith.constant 0 : index
    %12 = vector.load %arg6[%c0_11, %c0_12] : memref<1x128xf32, #tpu.memory_space<vmem>>, vector<1x128xf32>
    %13 = vector.broadcast %12 : vector<1x128xf32> to vector<80x128xf32>
    %14 = arith.addf %11, %13 : vector<80x128xf32>
    %cst_13 = arith.constant 0.000000e+00 : f32
    %15 = vector.broadcast %cst_13 : f32 to vector<80x128xf32>
    %16 = arith.maximumf %14, %15 : vector<80x128xf32>
    %c0_14 = arith.constant 0 : index
    %c0_15 = arith.constant 0 : index
    %17 = vector.load %arg7[%c0_14, %c0_15] : memref<128x4xf32, #tpu.memory_space<vmem>>, vector<128x4xf32>
    %cst_16 = arith.constant dense<0.000000e+00> : vector<80x4xf32>
    %18 = tpu.matmul %16, %17, %cst_16 {dimension_numbers = #tpu.dot_dimension_numbers<[1], [0], [0], [1], [0, 0, 1, 1], [], []>} : vector<80x128xf32>, vector<128x4xf32>, vector<80x4xf32> -> vector<80x4xf32>
    %c0_17 = arith.constant 0 : index
    %c0_18 = arith.constant 0 : index
    %19 = vector.load %arg8[%c0_17, %c0_18] : memref<1x4xf32, #tpu.memory_space<vmem>>, vector<1x4xf32>
    %20 = vector.broadcast %19 : vector<1x4xf32> to vector<80x4xf32>
    %21 = arith.addf %18, %20 : vector<80x4xf32>
    %22 = arith.negf %21 : vector<80x4xf32>
    %23 = math.exp %22 : vector<80x4xf32>
    %cst_19 = arith.constant 1.000000e+00 : f32
    %24 = vector.broadcast %cst_19 : f32 to vector<80x4xf32>
    %25 = arith.addf %24, %23 : vector<80x4xf32>
    %26 = arith.divf %24, %25 : vector<80x4xf32>
    %c0_20 = arith.constant 0 : index
    %c0_21 = arith.constant 0 : index
    %27 = vector.load %arg9[%c0_20, %c0_21] : memref<80x4xf32, #tpu.memory_space<vmem>>, vector<80x4xf32>
    tpu.vector_store %arg9[%c0_20, %c0_21], %26 {strides = array<i32>} : memref<80x4xf32, #tpu.memory_space<vmem>>, vector<80x4xf32>,
    return
  }
  func.func @transform_0(%arg0: i32) -> (i32, i32) {
    %c0_i32 = arith.constant 0 : i32
    %c0_i32_0 = arith.constant 0 : i32
    return %arg0, %c0_i32 : i32, i32
  }
  func.func @transform_1(%arg0: i32) -> (i32, i32) {
    %c0_i32 = arith.constant 0 : i32
    %c0_i32_0 = arith.constant 0 : i32
    return %arg0, %c0_i32 : i32, i32
  }
  func.func @transform_2(%arg0: i32) -> (i32, i32) {
    %c0_i32 = arith.constant 0 : i32
    %c0_i32_0 = arith.constant 0 : i32
    %c0_i32_1 = arith.constant 0 : i32
    return %c0_i32, %c0_i32_0 : i32, i32
  }
  func.func @transform_3(%arg0: i32) -> (i32, i32) {
    %c0_i32 = arith.constant 0 : i32
    %c0_i32_0 = arith.constant 0 : i32
    %c0_i32_1 = arith.constant 0 : i32
    return %c0_i32, %c0_i32_0 : i32, i32
  }
  func.func @transform_4(%arg0: i32) -> (i32, i32) {
    %c0_i32 = arith.constant 0 : i32
    %c0_i32_0 = arith.constant 0 : i32
    %c0_i32_1 = arith.constant 0 : i32
    return %c0_i32, %c0_i32_0 : i32, i32
  }
  func.func @transform_5(%arg0: i32) -> (i32, i32) {
    %c0_i32 = arith.constant 0 : i32
    %c0_i32_0 = arith.constant 0 : i32
    %c0_i32_1 = arith.constant 0 : i32
    return %c0_i32, %c0_i32_0 : i32, i32
  }
  func.func @transform_6(%arg0: i32) -> (i32, i32) {
    %c0_i32 = arith.constant 0 : i32
    %c0_i32_0 = arith.constant 0 : i32
    %c0_i32_1 = arith.constant 0 : i32
    return %c0_i32, %c0_i32_0 : i32, i32
  }
  func.func @transform_7(%arg0: i32) -> (i32, i32) {
    %c0_i32 = arith.constant 0 : i32
    %c0_i32_0 = arith.constant 0 : i32
    %c0_i32_1 = arith.constant 0 : i32
    return %c0_i32, %c0_i32_0 : i32, i32
  }
  func.func @transform_8(%arg0: i32) -> (i32, i32) {
    %c0_i32 = arith.constant 0 : i32
    %c0_i32_0 = arith.constant 0 : i32
    return %arg0, %c0_i32 : i32, i32
  }
}

</mosaic_0001>

<bundles_post_ra>
// kernel: tpu_custom_call.1
= control target key start
LH: loop header
LB: loop body
LE: loop exit
PB: predicated region body
PF: predicated region fallthrough
CT: control target
= control target key end

     0   :  { %13 = vsyncpa [#allocation3], 0  ;;  %s1317_s0 = inlined_call_operand.hbm [shape: f32[75,128], index: 0, kind: input, shape index: {}]   ;;  %s1318_s1 = inlined_call_operand.hbm [shape: f32[75,128], index: 1, kind: input, shape index: {}]   ;;  %s1319_s2 = inlined_call_operand.vmem [shape: f32[128,128], index: 2, kind: input, shape index: {}]   ;;  %s1320_s3 = inlined_call_operand.vmem [shape: f32[1,128], index: 3, kind: input, shape index: {}]   ;;  %s1321_s4 = inlined_call_operand.hbm [shape: f32[128,128], index: 4, kind: input, shape index: {}]   ;;  %s1322_s5 = inlined_call_operand.vmem [shape: f32[1,128], index: 5, kind: input, shape index: {}]   ;;  %s1323_s6 = inlined_call_operand.vmem [shape: f32[128,4], index: 6, kind: input, shape index: {}]   ;;  %s1324_s7 = inlined_call_operand.vmem [shape: f32[1,4], index: 7, kind: input, shape index: {}]   ;;  %s1325_s8 = inlined_call_operand.vmem [shape: f32[75,4], index: 8, kind: output, shape index: {}]  }
   0x1   :  { %14 = vsyncpa [#allocation5], 0  ;;  %s1070_s27 = smov [#allocation4]   ;;  %s1071_s29 = smov [#allocation2]  }
   0x2   :  { %s32_s28 = sshll.u32 %s1070_s27, 4  ;;  %s20_s30 = sshll.u32 %s1071_s29, 4  ;;  %s33_s28 = int_to_ptr.vmem [resolvable:$true] %s32_s28  ;;  %s1120_s30 = int_to_ptr.vmem [resolvable:$true] %s20_s30 }
   0x3   :  { %s1000_s11 = scalar_lea.hbm %s1318_s1, 1280 }
   0x4   :  { %p1001_p0 = scmp.ne.s32.totalorder %s1318_s1, %s1000_s11  ;;  %p1004_p1 = scmp.lt.u32.totalorder %s1000_s11, %s1318_s1 }
   0x6   :  { %p1006_p2 = pnand %p1004_p1, %p1001_p0 }
   0x8   :  { %1009 = shalt.err (!%p1006_p2)
}
   0x9   :  { %s1010_s16 = scalar_lea.vmem %s33_s28, 1280  ;;  %p1015_p4 = scmp.lt.s32.totalorder %s33_s28, %s33_s28 }
   0xa   :  { %p1011_p3 = scmp.ne.s32.totalorder %s33_s28, %s1010_s16  ;;  %p1016_p5 = scmp.lt.s32.totalorder %s1010_s16, %s1010_s16 }
   0xc   :  { %p1017_p6 = por %p1016_p5, %p1015_p4 }
   0xe   :  { %p1018_p7 = pnand %p1017_p6, %p1011_p3 }
  0x10   :  { %1021 = shalt.err (!%p1018_p7)
}
  0x11   :  { %s1072_s17 = smov 128   ;;  %s1073_s18 = smov 8  }
  0x12   :  { %38 = dma.hbm_to_vmem [thread:$0]  %s1318_s1, 1280, %s33_s28, [#allocation5], %s1072_s17, %s1072_s17, %s1073_s18  }
  0x13   :  { %s1022_s23 = scalar_lea.hbm %s1317_s0, 1280 }
  0x14   :  { %p1023_p8 = scmp.ne.s32.totalorder %s1317_s0, %s1022_s23  ;;  %p1026_p9 = scmp.lt.u32.totalorder %s1022_s23, %s1317_s0 }
  0x16   :  { %p1028_p10 = pnand %p1026_p9, %p1023_p8 }
  0x18   :  { %1031 = shalt.err (!%p1028_p10)
}
  0x19   :  { %s1032_s29 = scalar_lea.vmem %s1120_s30, 1280  ;;  %p1037_p12 = scmp.lt.s32.totalorder %s1120_s30, %s1120_s30 }
  0x1a   :  { %p1033_p11 = scmp.ne.s32.totalorder %s1120_s30, %s1032_s29  ;;  %p1038_p13 = scmp.lt.s32.totalorder %s1032_s29, %s1032_s29 }
  0x1c   :  { %p1039_p0 = por %p1038_p13, %p1037_p12 }
  0x1e   :  { %p1040_p1 = pnand %p1039_p0, %p1033_p11 }
  0x20   :  { %1043 = shalt.err (!%p1040_p1)
}
  0x21   :  { %26 = dma.hbm_to_vmem [thread:$0]  %s1317_s0, 1280, %s1120_s30, [#allocation3], %s1072_s17, %s1072_s17, %s1073_s18  }
  0x22   :  { %s1074_s9 = smov [#allocation6]   ;;  %s1044_s13 = scalar_lea.hbm %s1321_s4, 2048 }
  0x23   :  { %s48_s10 = sshll.u32 %s1074_s9, 4  ;;  %p1045_p2 = scmp.ne.s32.totalorder %s1321_s4, %s1044_s13  ;;  %s49_s10 = int_to_ptr.vmem [resolvable:$true] %s48_s10 }
  0x24   :  { %p1048_p3 = scmp.lt.u32.totalorder %s1044_s13, %s1321_s4 }
  0x26   :  { %p1050_p4 = pnand %p1048_p3, %p1045_p2 }
  0x28   :  { %1053 = shalt.err (!%p1050_p4)
}
  0x29   :  { %s1054_s20 = scalar_lea.vmem %s49_s10, 2048  ;;  %p1059_p6 = scmp.lt.s32.totalorder %s49_s10, %s49_s10 }
  0x2a   :  { %p1055_p5 = scmp.ne.s32.totalorder %s49_s10, %s1054_s20  ;;  %p1060_p7 = scmp.lt.s32.totalorder %s1054_s20, %s1054_s20 }
  0x2c   :  { %p1061_p8 = por %p1060_p7, %p1059_p6 }
  0x2e   :  { %p1062_p9 = pnand %p1061_p8, %p1055_p5 }
  0x30   :  { %1065 = shalt.err (!%p1062_p9)
}
  0x31   :  { %54 = dma.hbm_to_vmem [thread:$0]  %s1321_s4, 2048, %s49_s10, [#allocation5], %s1072_s17, %s1072_s17, %s1073_s18  }
  0x32   :  { %1066 = dma.done.wait [#allocation3], 1280  }
  0x33   :  { %1067 = vsyncadd [#allocation3], 4294966016 }
  0x34   :  { %1068 = dma.done.wait [#allocation5], 3328  }
  0x35   :  { %1069 = vsyncadd [#allocation5], 4294963968  ;;  %v100_v0 = vld [vmem:[%s1319_s2] sm:$0xff]  ;;  %v101_v1 = vld [vmem:[%s1319_s2 + $0x8] sm:$0xff]  ;;  %vm594_vm0 = vcmask 31744  }
  0x36   :  { %v102_v2 = vld [vmem:[%s1319_s2 + $0x10] sm:$0xff]  ;;  %v843_v3 = vpack.c.bf16 %v101_v1, %v100_v0  ;;  %v103_v4 = vld [vmem:[%s1319_s2 + $0x18] sm:$0xff]  ;;  %v104_v6 = vld [vmem:[%s1319_s2 + $0x20] sm:$0xff] }
  0x37   :  { %v847_v5 = vpack.c.bf16 %v103_v4, %v102_v2  ;;  %v105_v7 = vld [vmem:[%s1319_s2 + $0x28] sm:$0xff]  ;;  %v70_v9 = vld [vmem:[#allocation2] sm:$0xff]  ;;  %v80_v10 = vld [vmem:[#allocation4] sm:$0xff] }
  0x38   :  { %844 = vmatprep.subr.bf16.mxu0 %v843_v3  ;;  %v851_v8 = vpack.c.bf16 %v105_v7, %v104_v6  ;;  %v106_v11 = vld [vmem:[%s1319_s2 + $0x30] sm:$0xff]  ;;  %v107_v12 = vld [vmem:[%s1319_s2 + $0x38] sm:$0xff]  ;;  %v90_v13 = vmul.f32 %v80_v10, %v70_v9  ;;  %v108_v15 = vld [vmem:[%s1319_s2 + $0x40] sm:$0xff] }
  0x39   :  { %846 = vmatpush3.bf16.msra.mxu0 %v843_v3  ;;  %v855_v14 = vpack.c.bf16 %v107_v12, %v106_v11  ;;  %v109_v16 = vld [vmem:[%s1319_s2 + $0x48] sm:$0xff]  ;;  %v248_v17 = vld [vmem:[#allocation6] sm:$0xff]  ;;  %v250_v19 = vld [vmem:[#allocation6 + $0x10] sm:$0xff] }
  0x3a   :  { %848 = vmatprep.subr.bf16.mxu0 %v847_v5  ;;  %734 = vmatprep.mubr.f32.mxu0 %v90_v13  ;;  %v249_v18 = vld [vmem:[#allocation6 + $0x8] sm:$0xff]  ;;  %v859_v20 = vpack.c.bf16 %v109_v16, %v108_v15  ;;  %v110_v21 = vld [vmem:[%s1319_s2 + $0x50] sm:$0xff]  ;;  %v251_v23 = vld [vmem:[#allocation6 + $0x18] sm:$0xff] }
  0x3b   :  { %v875_v22 = vpack.c.bf16 %v249_v18, %v248_v17  ;;  %v111_v24 = vld [vmem:[%s1319_s2 + $0x58] sm:$0xff]  ;;  %v879_v25 = vpack.c.bf16 %v251_v23, %v250_v19  ;;  %v252_v26 = vld [vmem:[#allocation6 + $0x20] sm:$0xff]  ;;  %v253_v27 = vld [vmem:[#allocation6 + $0x28] sm:$0xff] }
  0x3c   :  { %v863_v28 = vpack.c.bf16 %v111_v24, %v110_v21  ;;  %v112_v29 = vld [vmem:[%s1319_s2 + $0x60] sm:$0xff]  ;;  %v883_v30 = vpack.c.bf16 %v253_v27, %v252_v26  ;;  %v113_v31 = vld [vmem:[%s1319_s2 + $0x68] sm:$0xff]  ;;  %v254_v32 = vld [vmem:[#allocation6 + $0x30] sm:$0xff] }
  0x3d   :  { %850 = vmatpush3.bf16.msra.mxu0 %v847_v5  ;;  %876 = vmatprep.subr.bf16.mxu1 %v875_v22  ;;  %v255_v33 = vld [vmem:[#allocation6 + $0x38] sm:$0xff]  ;;  %v867_v34 = vpack.c.bf16 %v113_v31, %v112_v29  ;;  %v114_v35 = vld [vmem:[%s1319_s2 + $0x70] sm:$0xff]  ;;  %v256_v38 = vld [vmem:[#allocation6 + $0x40] sm:$0xff] }
  0x3e   :  { %852 = vmatprep.subr.bf16.mxu0 %v851_v8  ;;  %878 = vmatpush3.bf16.msra.mxu1 %v875_v22  ;;  %v887_v36 = vpack.c.bf16 %v255_v33, %v254_v32  ;;  %v115_v37 = vld [vmem:[%s1319_s2 + $0x78] sm:$0xff]  ;;  %v257_v39 = vld [vmem:[#allocation6 + $0x48] sm:$0xff]  ;;  %v258_v42 = vld [vmem:[#allocation6 + $0x50] sm:$0xff] }
  0x3f   :  { %880 = vmatprep.subr.bf16.mxu1 %v879_v25  ;;  %v871_v40 = vpack.c.bf16 %v115_v37, %v114_v35  ;;  %v891_v41 = vpack.c.bf16 %v257_v39, %v256_v38  ;;  %v259_v43 = vld [vmem:[#allocation6 + $0x58] sm:$0xff]  ;;  %v71_v44 = vld [vmem:[#allocation2 + $0x8] sm:$0xff]  ;;  %v72_v46 = vld [vmem:[#allocation2 + $0x10] sm:$0xff] }
  0x40   :  { %v81_v45 = vld [vmem:[#allocation4 + $0x8] sm:$0xff]  ;;  %v82_v47 = vld [vmem:[#allocation4 + $0x10] sm:$0xff]  ;;  %v895_v48 = vpack.c.bf16 %v259_v43, %v258_v42  ;;  %v261_v50 = vld [vmem:[#allocation6 + $0x68] sm:$0xff] }
  0x41   :  { %854 = vmatpush3.bf16.msra.mxu0 %v851_v8  ;;  %v260_v49 = vld [vmem:[#allocation6 + $0x60] sm:$0xff]  ;;  %v91_v51 = vmul.f32 %v81_v45, %v71_v44  ;;  %v92_v52 = vmul.f32 %v82_v47, %v72_v46  ;;  %v73_v53 = vld [vmem:[#allocation2 + $0x18] sm:$0xff]  ;;  %v83_v54 = vld [vmem:[#allocation4 + $0x18] sm:$0xff] }
  0x42   :  { %856 = vmatprep.subr.bf16.mxu0 %v855_v14  ;;  %882 = vmatpush3.bf16.msra.mxu1 %v879_v25  ;;  %v74_v55 = vld [vmem:[#allocation2 + $0x20] sm:$0xff]  ;;  %v84_v56 = vld [vmem:[#allocation4 + $0x20] sm:$0xff]  ;;  %v899_v57 = vpack.c.bf16 %v261_v50, %v260_v49  ;;  %v93_v58 = vmul.f32 %v83_v54, %v73_v53  ;;  %v75_v60 = vld [vmem:[#allocation2 + $0x28] sm:$0xff] }
  0x43   :  { %884 = vmatprep.subr.bf16.mxu1 %v883_v30  ;;  %v94_v59 = vmul.f32 %v84_v56, %v74_v55  ;;  %v85_v61 = vld [vmem:[#allocation4 + $0x28] sm:$0xff]  ;;  %v76_v62 = vld [vmem:[#allocation2 + $0x30] sm:$0xff]  ;;  %v86_v63 = vld [vmem:[#allocation4 + $0x30] sm:$0xff] }
  0x44   :  { %v95_v0 = vmul.f32 %v85_v61, %v75_v60  ;;  %v96_v1 = vmul.f32 %v86_v63, %v76_v62  ;;  %v77_v2 = vld [vmem:[#allocation2 + $0x38] sm:$0xff]  ;;  %v87_v3 = vld [vmem:[#allocation4 + $0x38] sm:$0xff]  ;;  %v78_v4 = vld [vmem:[#allocation2 + $0x40] sm:$0xff] }
  0x45   :  { %858 = vmatpush3.bf16.msra.mxu0 %v855_v14  ;;  %v88_v5 = vld [vmem:[#allocation4 + $0x40] sm:$0xff]  ;;  %v97_v6 = vmul.f32 %v87_v3, %v77_v2  ;;  %v79_v8 = vld [vmem:[#allocation2 + $0x48] sm:$0xff]  ;;  %v89_v9 = vld [vmem:[#allocation4 + $0x48] sm:$0xff] }
  0x46   :  { %860 = vmatprep.subr.bf16.mxu0 %v859_v20  ;;  %886 = vmatpush3.bf16.msra.mxu1 %v883_v30  ;;  %v98_v7 = vmul.f32 %v88_v5, %v78_v4  ;;  %v99_v10 = vmul.f32 %v89_v9, %v79_v8  ;;  %v262_v11 = vld [vmem:[#allocation6 + $0x70] sm:$0xff]  ;;  %v263_v12 = vld [vmem:[#allocation6 + $0x78] sm:$0xff]  ;;  %v396_v14 = vld [vmem:[%s1323_s6] sm:$0xff] }
  0x47   :  { %888 = vmatprep.subr.bf16.mxu1 %v887_v36  ;;  %v903_v13 = vpack.c.bf16 %v263_v12, %v262_v11  ;;  %v397_v15 = vld [vmem:[%s1323_s6 + $0x8] sm:$0xff]  ;;  %v398_v16 = vld [vmem:[%s1323_s6 + $0x10] sm:$0xff]  ;;  %v399_v18 = vld [vmem:[%s1323_s6 + $0x18] sm:$0xff] }
  0x48   :  { %v907_v17 = vpack.c.bf16 %v397_v15, %v396_v14  ;;  %v911_v19 = vpack.c.bf16 %v399_v18, %v398_v16  ;;  %v401_v21 = vld [vmem:[%s1323_s6 + $0x28] sm:$0xff]  ;;  %v402_v23 = vld [vmem:[%s1323_s6 + $0x30] sm:$0xff]  ;;  %v403_v24 = vld [vmem:[%s1323_s6 + $0x38] sm:$0xff] }
  0x49   :  { %862 = vmatpush3.bf16.msra.mxu0 %v859_v20  ;;  %v400_v20 = vld [vmem:[%s1323_s6 + $0x20] sm:$0xff]  ;;  %v919_v25 = vpack.c.bf16 %v403_v24, %v402_v23  ;;  %v405_v27 = vld [vmem:[%s1323_s6 + $0x48] sm:$0xff]  ;;  %v406_v29 = vld [vmem:[%s1323_s6 + $0x50] sm:$0xff] }
  0x4a   :  { %864 = vmatprep.subr.bf16.mxu0 %v863_v28  ;;  %890 = vmatpush3.bf16.msra.mxu1 %v887_v36  ;;  %v915_v22 = vpack.c.bf16 %v401_v21, %v400_v20  ;;  %v404_v26 = vld [vmem:[%s1323_s6 + $0x40] sm:$0xff]  ;;  %v407_v30 = vld [vmem:[%s1323_s6 + $0x58] sm:$0xff]  ;;  %v409_v33 = vld [vmem:[%s1323_s6 + $0x68] sm:$0xff] }
  0x4b   :  { %892 = vmatprep.subr.bf16.mxu1 %v891_v41  ;;  %v927_v31 = vpack.c.bf16 %v407_v30, %v406_v29  ;;  %v408_v32 = vld [vmem:[%s1323_s6 + $0x60] sm:$0xff]  ;;  %v410_v2 = vld [vmem:[%s1323_s6 + $0x70] sm:$0xff]  ;;  %v411_v3 = vld [vmem:[%s1323_s6 + $0x78] sm:$0xff] }
  0x4c   :  { %v611_v35 = vld [vmem:[%s1320_s3] ss:$0 sm:$0xff]  ;;  %v935_v4 = vpack.c.bf16 %v411_v3, %v410_v2 }
  0x4d   :  { %866 = vmatpush3.bf16.msra.mxu0 %v863_v28  ;;  %v923_v28 = vpack.c.bf16 %v405_v27, %v404_v26  ;;  %v612_v5 = vld [vmem:[%s1322_s5] ss:$0 sm:$0xff] }
  0x4e   :  { %868 = vmatprep.subr.bf16.mxu0 %v867_v34  ;;  %894 = vmatpush3.bf16.msra.mxu1 %v891_v41 }
  0x4f   :  { %896 = vmatprep.subr.bf16.mxu1 %v895_v48 }
  0x51   :  { %870 = vmatpush3.bf16.msra.mxu0 %v867_v34  ;;  %v931_v34 = vpack.c.bf16 %v409_v33, %v408_v32 }
  0x52   :  { %872 = vmatprep.subr.bf16.mxu0 %v871_v40  ;;  %898 = vmatpush3.bf16.msra.mxu1 %v895_v48 }
  0x53   :  { %900 = vmatprep.subr.bf16.mxu1 %v899_v57 }
  0x55   :  { %874 = vmatpush3.bf16.msra.mxu0 %v871_v40 }
  0x56   :  { %902 = vmatpush3.bf16.msra.mxu1 %v899_v57  ;;  %908 = vmatprep.subr.bf16.mxu0 %v907_v17 }
  0x57   :  { %904 = vmatprep.subr.bf16.mxu1 %v903_v13 }
  0x58   :  { %735 = vmatmul.mubr.f32.vlgmr.msra.gmra.mrb[0].mxu0 %v91_v51 }
  0x59   :  { %737 = vmatprep.mubr.f32.mxu0 %v92_v52  ;;  %910 = vmatpush3.bf16.msra.mxu0 %v907_v17 }
  0x5a   :  { %906 = vmatpush3.bf16.msra.mxu1 %v903_v13  ;;  %912 = vmatprep.subr.bf16.mxu0 %v911_v19 }
  0x5b   :  { %939 = vmatprep.subr.bf16.mxu1 %v907_v17 }
  0x5c   :  { %738 = vmatmul.mubr.f32.gmra.mrb[2].mxu0 %v93_v58 }
  0x5d   :  { %740 = vmatprep.mubr.f32.mxu0 %v94_v59  ;;  %914 = vmatpush3.bf16.msra.mxu0 %v911_v19 }
  0x5e   :  { %916 = vmatprep.subr.bf16.mxu0 %v915_v22 }
  0x60   :  { %741 = vmatmul.mubr.f32.gmra.mrb[4].mxu0 %v95_v0 }
  0x61   :  { %743 = vmatprep.mubr.f32.mxu0 %v96_v1  ;;  %918 = vmatpush3.bf16.msra.mxu0 %v915_v22 }
  0x62   :  { %920 = vmatprep.subr.bf16.mxu0 %v919_v25 }
  0x64   :  { %744 = vmatmul.mubr.f32.gmra.mrb[6].mxu0 %v97_v6 }
  0x65   :  { %746 = vmatprep.mubr.f32.mxu0 %v98_v7  ;;  %922 = vmatpush3.bf16.msra.mxu0 %v919_v25 }
  0x66   :  { %924 = vmatprep.subr.bf16.mxu0 %v923_v28 }
  0x68   :  { %747 = vmatmul.mubr.f32.gmra.mrb[8].mxu0 %v99_v10 }
  0x69   :  { %926 = vmatpush3.bf16.msra.mxu0 %v923_v28 }
  0x6a   :  { %928 = vmatprep.subr.bf16.mxu0 %v927_v31 }
  0x6d   :  { %930 = vmatpush3.bf16.msra.mxu0 %v927_v31 }
  0x6e   :  { %932 = vmatprep.subr.bf16.mxu0 %v931_v34 }
  0x71   :  { %934 = vmatpush3.bf16.msra.mxu0 %v931_v34 }
  0x72   :  { %936 = vmatprep.subr.bf16.mxu0 %v935_v4 }
  0x75   :  { %938 = vmatpush3.bf16.msra.mxu0 %v935_v4 }
 0x12b   :  { %v736_v36 = vpop.f32.mrb[0].mxu0 }
 0x12c   :  { %v195_v37 = vadd.f32 %v736_v36, %v611_v35  ;;  %v189_v38 = vpop.f32.mrb[1].mxu0  ;;  %v613_v36 = vld [vmem:[%s1324_s7] ss:$0 sm:$0xff] }
 0x12d   :  { %v190_v39 = vadd.f32 %v611_v35, %v189_v38 }
 0x12e   :  { %v239_v42 = vmax.f32 %v195_v37, 0.0 }
 0x12f   :  { %v739_v40 = vpop.f32.mrb[2].mxu0  ;;  %v238_v41 = vmax.f32 %v190_v39, 0.0 }
 0x130   :  { %v205_v43 = vadd.f32 %v739_v40, %v611_v35  ;;  %v199_v44 = vpop.f32.mrb[3].mxu0 }
 0x131   :  { %v200_v45 = vadd.f32 %v611_v35, %v199_v44  ;;  %781 = vmatprep.mubr.f32.mxu1 %v238_v41 }
 0x132   :  { %782 = vmatmul.mubr.f32.vlgmr.msra.gmra.mrb[0].mxu1 %v239_v42  ;;  %v241_v48 = vmax.f32 %v205_v43, 0.0 }
 0x133   :  { %v240_v46 = vmax.f32 %v200_v45, 0.0  ;;  %v742_v47 = vpop.f32.mrb[4].mxu0  ;;  %947 = vmatpush3.bf16.msra.mxu1 %v907_v17 }
 0x134   :  { %v215_v49 = vadd.f32 %v742_v47, %v611_v35  ;;  %v209_v50 = vpop.f32.mrb[5].mxu0  ;;  %940 = vmatprep.subr.bf16.mxu1 %v911_v19 }
 0x135   :  { %v210_v51 = vadd.f32 %v611_v35, %v209_v50  ;;  %784 = vmatprep.mubr.f32.mxu1 %v240_v46 }
 0x136   :  { %785 = vmatmul.mubr.f32.gmra.mrb[2].mxu1 %v241_v48  ;;  %v243_v54 = vmax.f32 %v215_v49, 0.0 }
 0x137   :  { %v242_v52 = vmax.f32 %v210_v51, 0.0  ;;  %v745_v53 = vpop.f32.mrb[6].mxu0  ;;  %948 = vmatpush3.bf16.msra.mxu1 %v911_v19 }
 0x138   :  { %v225_v55 = vadd.f32 %v745_v53, %v611_v35  ;;  %v219_v56 = vpop.f32.mrb[7].mxu0  ;;  %941 = vmatprep.subr.bf16.mxu1 %v915_v22 }
 0x139   :  { %v220_v57 = vadd.f32 %v611_v35, %v219_v56  ;;  %787 = vmatprep.mubr.f32.mxu1 %v242_v52 }
 0x13a   :  { %788 = vmatmul.mubr.f32.gmra.mrb[4].mxu1 %v243_v54  ;;  %v245_v60 = vmax.f32 %v225_v55, 0.0 }
 0x13b   :  { %v244_v58 = vmax.f32 %v220_v57, 0.0  ;;  %v748_v59 = vpop.f32.mrb[8].mxu0  ;;  %949 = vmatpush3.bf16.msra.mxu1 %v915_v22 }
 0x13c   :  { %v235_v61 = vadd.f32 %v748_v59, %v611_v35  ;;  %v229_v62 = vpop.f32.mrb[9].mxu0  ;;  %942 = vmatprep.subr.bf16.mxu1 %v919_v25 }
 0x13d   :  { %v230_v63 = vadd.f32 %v611_v35, %v229_v62  ;;  %790 = vmatprep.mubr.f32.mxu1 %v244_v58 }
 0x13e   :  { %791 = vmatmul.mubr.f32.gmra.mrb[6].mxu1 %v245_v60  ;;  %v247_v1 = vmax.f32 %v235_v61, 0.0 }
 0x13f   :  { %v246_v0 = vmax.f32 %v230_v63, 0.0  ;;  %950 = vmatpush3.bf16.msra.mxu1 %v919_v25 }
 0x140   :  { %943 = vmatprep.subr.bf16.mxu1 %v923_v28 }
 0x141   :  { %793 = vmatprep.mubr.f32.mxu1 %v246_v0 }
 0x142   :  { %794 = vmatmul.mubr.f32.gmra.mrb[8].mxu1 %v247_v1 }
 0x143   :  { %951 = vmatpush3.bf16.msra.mxu1 %v923_v28 }
 0x144   :  { %944 = vmatprep.subr.bf16.mxu1 %v927_v31 }
 0x147   :  { %952 = vmatpush3.bf16.msra.mxu1 %v927_v31 }
 0x148   :  { %945 = vmatprep.subr.bf16.mxu1 %v931_v34 }
 0x14b   :  { %953 = vmatpush3.bf16.msra.mxu1 %v931_v34 }
 0x14c   :  { %946 = vmatprep.subr.bf16.mxu1 %v935_v4 }
 0x14f   :  { %954 = vmatpush3.bf16.msra.mxu1 %v935_v4 }
 0x205   :  { %v783_v6 = vpop.f32.mrb[0].mxu1 }
 0x206   :  { %v343_v7 = vadd.f32 %v783_v6, %v612_v5  ;;  %v337_v8 = vpop.f32.mrb[1].mxu1 }
 0x207   :  { %v338_v9 = vadd.f32 %v612_v5, %v337_v8 }
 0x208   :  { %v387_v12 = vmax.f32 %v343_v7, 0.0 }
 0x209   :  { %v386_v10 = vmax.f32 %v338_v9, 0.0  ;;  %v786_v11 = vpop.f32.mrb[2].mxu1 }
 0x20a   :  { %v353_v13 = vadd.f32 %v786_v11, %v612_v5  ;;  %v347_v14 = vpop.f32.mrb[3].mxu1 }
 0x20b   :  { %v348_v15 = vadd.f32 %v612_v5, %v347_v14  ;;  %828 = vmatprep.mubr.f32.mxu0 %v386_v10 }
 0x20c   :  { %829 = vmatmul.mubr.f32.vlgmr.msra.gmra.mrb[10].mxu0 %v387_v12  ;;  %v389_v18 = vmax.f32 %v353_v13, 0.0 }
 0x20d   :  { %v388_v16 = vmax.f32 %v348_v15, 0.0  ;;  %v789_v17 = vpop.f32.mrb[4].mxu1 }
 0x20e   :  { %v363_v19 = vadd.f32 %v789_v17, %v612_v5  ;;  %v357_v20 = vpop.f32.mrb[5].mxu1 }
 0x20f   :  { %v358_v21 = vadd.f32 %v612_v5, %v357_v20  ;;  %831 = vmatprep.mubr.f32.mxu0 %v388_v16 }
 0x210   :  { %832 = vmatmul.mubr.f32.gmra.mrb[12].mxu0 %v389_v18  ;;  %v391_v24 = vmax.f32 %v363_v19, 0.0 }
 0x211   :  { %v390_v22 = vmax.f32 %v358_v21, 0.0  ;;  %v792_v23 = vpop.f32.mrb[6].mxu1 }
 0x212   :  { %v373_v25 = vadd.f32 %v792_v23, %v612_v5  ;;  %v367_v26 = vpop.f32.mrb[7].mxu1 }
 0x213   :  { %v368_v27 = vadd.f32 %v612_v5, %v367_v26  ;;  %834 = vmatprep.mubr.f32.mxu0 %v390_v22 }
 0x214   :  { %835 = vmatmul.mubr.f32.gmra.mrb[14].mxu0 %v391_v24  ;;  %v393_v30 = vmax.f32 %v373_v25, 0.0 }
 0x215   :  { %v392_v28 = vmax.f32 %v368_v27, 0.0  ;;  %v795_v29 = vpop.f32.mrb[8].mxu1 }
 0x216   :  { %v383_v31 = vadd.f32 %v795_v29, %v612_v5  ;;  %v377_v32 = vpop.f32.mrb[9].mxu1 }
 0x217   :  { %v378_v33 = vadd.f32 %v612_v5, %v377_v32  ;;  %837 = vmatprep.mubr.f32.mxu1 %v392_v28 }
 0x218   :  { %838 = vmatmul.mubr.f32.vlgmr.msra.gmra.mrb[10].mxu1 %v393_v30  ;;  %v395_v35 = vmax.f32 %v383_v31, 0.0 }
 0x219   :  { %v394_v34 = vmax.f32 %v378_v33, 0.0 }
 0x21b   :  { %840 = vmatprep.mubr.f32.mxu1 %v394_v34 }
 0x21c   :  { %841 = vmatmul.mubr.f32.gmra.mrb[12].mxu1 %v395_v35 }
 0x2df   :  { %v830_v37 = vpop.f32.mrb[10].mxu0 }
 0x2e0   :  { %v491_v38 = vadd.f32 %v830_v37, %v613_v36  ;;  %v485_v39 = vpop.f32.mrb[11].mxu0 }
 0x2e1   :  { %v486_v40 = vadd.f32 %v613_v36, %v485_v39 }
 0x2e2   :  { %v615_v41 = vmul.f32 -1.442695, %v491_v38 }
 0x2e3   :  { %v614_v42 = vmul.f32 -1.442695, %v486_v40  ;;  %v833_v43 = vpop.f32.mrb[12].mxu0 }
 0x2e4   :  { %960 = vpow2.f32 %v615_v41  ;;  %v501_v44 = vadd.f32 %v833_v43, %v613_v36  ;;  %v495_v45 = vpop.f32.mrb[13].mxu0 }
 0x2e5   :  { %962 = vpow2.f32 %v614_v42  ;;  %v496_v46 = vadd.f32 %v613_v36, %v495_v45 }
 0x2e6   :  { %v617_v47 = vmul.f32 -1.442695, %v501_v44 }
 0x2e7   :  { %v616_v48 = vmul.f32 -1.442695, %v496_v46  ;;  %v836_v49 = vpop.f32.mrb[14].mxu0 }
 0x2e8   :  { %964 = vpow2.f32 %v617_v47  ;;  %v511_v50 = vadd.f32 %v836_v49, %v613_v36  ;;  %v505_v51 = vpop.f32.mrb[15].mxu0 }
 0x2e9   :  { %966 = vpow2.f32 %v616_v48  ;;  %v506_v52 = vadd.f32 %v613_v36, %v505_v51 }
 0x2ea   :  { %v619_v53 = vmul.f32 -1.442695, %v511_v50 }
 0x2eb   :  { %v618_v54 = vmul.f32 -1.442695, %v506_v52  ;;  %v839_v55 = vpop.f32.mrb[10].mxu1 }
 0x2ec   :  { %968 = vpow2.f32 %v619_v53  ;;  %v521_v56 = vadd.f32 %v839_v55, %v613_v36  ;;  %v515_v57 = vpop.f32.mrb[11].mxu1 }
 0x2ed   :  { %970 = vpow2.f32 %v618_v54  ;;  %v516_v58 = vadd.f32 %v613_v36, %v515_v57 }
 0x2ee   :  { %v961_v59 = vpop.eup %960  ;;  %v621_v60 = vmul.f32 -1.442695, %v521_v56 }
 0x2ef   :  { %v963_v61 = vpop.eup %962  ;;  %v565_v62 = vadd.f32 1.0, %v961_v59  ;;  %v620_v63 = vmul.f32 -1.442695, %v516_v58  ;;  %v842_v0 = vpop.f32.mrb[12].mxu1 }
 0x2f0   :  { %v564_v1 = vadd.f32 1.0, %v963_v61  ;;  %972 = vpow2.f32 %v621_v60  ;;  %v531_v2 = vadd.f32 %v842_v0, %v613_v36  ;;  %v525_v3 = vpop.f32.mrb[13].mxu1 }
 0x2f1   :  { %974 = vrcp.f32 %v565_v62  ;;  %v526_v4 = vadd.f32 %v613_v36, %v525_v3 }
 0x2f2   :  { %v965_v5 = vpop.eup %964  ;;  %976 = vrcp.f32 %v564_v1  ;;  %v623_v6 = vmul.f32 -1.442695, %v531_v2 }
 0x2f3   :  { %v967_v7 = vpop.eup %966  ;;  %v567_v8 = vadd.f32 1.0, %v965_v5  ;;  %978 = vpow2.f32 %v620_v63  ;;  %v622_v9 = vmul.f32 -1.442695, %v526_v4 }
 0x2f4   :  { %v566_v10 = vadd.f32 1.0, %v967_v7  ;;  %980 = vpow2.f32 %v623_v6 }
 0x2f5   :  { %982 = vrcp.f32 %v567_v8 }
 0x2f6   :  { %v969_v11 = vpop.eup %968  ;;  %984 = vrcp.f32 %v566_v10 }
 0x2f7   :  { %v971_v12 = vpop.eup %970  ;;  %v569_v13 = vadd.f32 1.0, %v969_v11  ;;  %986 = vpow2.f32 %v622_v9 }
 0x2f8   :  { %v568_v14 = vadd.f32 1.0, %v971_v12 }
 0x2f9   :  { %988 = vrcp.f32 %v569_v13 }
 0x2fa   :  { %v973_v15 = vpop.eup %972  ;;  %990 = vrcp.f32 %v568_v14 }
 0x2fb   :  { %v975_v16 = vpop.eup %974  ;;  %v571_v17 = vadd.f32 1.0, %v973_v15 }
 0x2fc   :  { %v977_v18 = vpop.eup %976  ;;  %596 = vst.msk [vmem:[%s1325_s8 + $0x8] sm:$0xff] %vm594_vm0, %v975_v16 }
 0x2fd   :  { %v979_v19 = vpop.eup %978  ;;  %595 = vst.msk [vmem:[%s1325_s8] sm:$0xff] %vm594_vm0, %v977_v18  ;;  %992 = vrcp.f32 %v571_v17 }
 0x2fe   :  { %v981_v20 = vpop.eup %980  ;;  %v570_v21 = vadd.f32 1.0, %v979_v19 }
 0x2ff   :  { %v983_v22 = vpop.eup %982  ;;  %v573_v23 = vadd.f32 1.0, %v981_v20 }
 0x300   :  { %v985_v24 = vpop.eup %984  ;;  %598 = vst.msk [vmem:[%s1325_s8 + $0x18] sm:$0xff] %vm594_vm0, %v983_v22  ;;  %994 = vrcp.f32 %v570_v21 }
 0x301   :  { %v987_v25 = vpop.eup %986  ;;  %597 = vst.msk [vmem:[%s1325_s8 + $0x10] sm:$0xff] %vm594_vm0, %v985_v24  ;;  %996 = vrcp.f32 %v573_v23 }
 0x302   :  { %v572_v26 = vadd.f32 1.0, %v987_v25 }
 0x303   :  { %v989_v27 = vpop.eup %988 }
 0x304   :  { %v991_v28 = vpop.eup %990  ;;  %600 = vst.msk [vmem:[%s1325_s8 + $0x28] sm:$0xff] %vm594_vm0, %v989_v27  ;;  %998 = vrcp.f32 %v572_v26 }
 0x305   :  { %599 = vst.msk [vmem:[%s1325_s8 + $0x20] sm:$0xff] %vm594_vm0, %v991_v28 }
 0x307   :  { %v993_v29 = vpop.eup %992 }
 0x308   :  { %602 = vst.msk [vmem:[%s1325_s8 + $0x38] sm:$0xff] %vm594_vm0, %v993_v29 }
 0x30a   :  { %v995_v30 = vpop.eup %994 }
 0x30b   :  { %v997_v31 = vpop.eup %996  ;;  %601 = vst.msk [vmem:[%s1325_s8 + $0x30] sm:$0xff] %vm594_vm0, %v995_v30 }
 0x30c   :  { %604 = vst.msk [vmem:[%s1325_s8 + $0x48] sm:$0xff] %vm594_vm0, %v997_v31 }
 0x30e   :  { %v999_v32 = vpop.eup %998 }
 0x30f   :  { %603 = vst.msk [vmem:[%s1325_s8 + $0x40] sm:$0xff] %vm594_vm0, %v999_v32 }
 0x310   :  { %609 = vsyncpa [#allocation3], 1 }
 0x311   :  { %610 = vsyncpa [#allocation5], 1 }

</bundles_post_ra>
